<compile_context>
chip_gen: v7x
topology: tpu7x:2x2x1
jax: 0.10.0
libtpu: 0.0.40
codegen_flags: <defaults>
</compile_context>

<pallas_src>
import functools

import jax
import jax.numpy as jnp
from jax.experimental import pallas as pl
from jax.experimental.pallas import tpu as pltpu


def _round_up(x, m):
    return ((x + m - 1) // m) * m


def _pick_tm(n_pad):
    for t in (512, 256, 128):
        if n_pad % t == 0 and n_pad // t >= 2:
            return t
    return min(n_pad, 128)


def _pick_tk(n_pad):
    for t in (512, 256, 128):
        if n_pad % t == 0:
            return t
    return min(n_pad, 128)


# ----------------------------- kernels ------------------------------------- #

def _feature_transform_kernel(x_ref, w_ref, dis_ref, o_ref):
    # One row-tile of D^-1/2 (X @ W): bf16 inputs, f32 MXU accumulation,
    # row-scale by d_inv_sqrt, bf16 store (lane-dense, f_pad multiple of 128).
    xw = jnp.dot(x_ref[...], w_ref[...], preferred_element_type=jnp.float32)
    o_ref[...] = (xw * dis_ref[...]).astype(o_ref.dtype)


def _aggregate_kernel(a_ref, xw_ref, dis_ref, b_ref, o_ref, acc_ref):
    # out[row_tile] = relu( d_row * sum_k A01[row_tile, k] @ XWs[k] + b ), masked.
    k = pl.program_id(1)
    tk = a_ref.shape[1]

    @pl.when(k == 0)
    def _():
        acc_ref[...] = jnp.zeros_like(acc_ref)

    a_tile = a_ref[...].astype(jnp.bfloat16)          # int8 0/1 -> bf16 (exact)
    if xw_ref.shape[0] == tk:
        xw_tile = xw_ref[...]                          # streamed (tk, f_pad) slab
    else:
        start = pl.multiple_of(k * tk, tk)             # VMEM-resident XW: slice it
        xw_tile = xw_ref[pl.ds(start, tk), :]
    acc_ref[...] += jnp.dot(a_tile, xw_tile, preferred_element_type=jnp.float32)

    @pl.when(k == pl.num_programs(1) - 1)
    def _():
        scale = dis_ref[...]                           # (tm, 1) f32; 0 on padded rows
        out = jnp.maximum(acc_ref[...] * scale + b_ref[...], 0.0)
        o_ref[...] = jnp.where(scale > 0.0, out, 0.0).astype(o_ref.dtype)


def _pool_kernel(p_ref, invc_ref, h_ref, o_ref):
    # scatter_mean as (one-hot P) @ H, accumulated directly into the resident
    # f32 output block; exact 1/count applied in the epilogue.
    k = pl.program_id(0)

    @pl.when(k == 0)
    def _():
        o_ref[...] = jnp.zeros_like(o_ref)

    o_ref[...] += jnp.dot(p_ref[...], h_ref[...], preferred_element_type=jnp.float32)

    @pl.when(k == pl.num_programs(0) - 1)
    def _():
        o_ref[...] = o_ref[...] * invc_ref[...]


def _fused_kernel(a_ref, dis_ref, p_ref, invc_ref, x_ref, w1_ref, b1_ref,
                  w2_ref, b2_ref, o_ref):
    # Whole forward in one kernel: A read once, intermediates never leave VMEM.
    a = a_ref[...].astype(jnp.bfloat16)                # 0/1, exact
    dis = dis_ref[...]                                 # (n_pad, 1) f32
    valid = dis > 0.0

    def gcn_layer(h_bf16, w_ref, b_ref):
        xw = jnp.dot(h_bf16, w_ref[...], preferred_element_type=jnp.float32)
        xw = (xw * dis).astype(jnp.bfloat16)           # D^-1/2 (H W)
        agg = jnp.dot(a, xw, preferred_element_type=jnp.float32)
        out = jnp.maximum(agg * dis + b_ref[...], 0.0)
        return jnp.where(valid, out, 0.0).astype(jnp.bfloat16)

    h1 = gcn_layer(x_ref[...], w1_ref, b1_ref)
    h2 = gcn_layer(h1, w2_ref, b2_ref)
    pooled = jnp.dot(p_ref[...], h2, preferred_element_type=jnp.float32)
    o_ref[...] = pooled * invc_ref[...]


# --------------------------- pallas_call wrappers --------------------------- #

def _feature_transform(x_b, w_b, dis, tm):
    n_pad, f_in_p = x_b.shape
    f_out_p = w_b.shape[1]
    return pl.pallas_call(
        _feature_transform_kernel,
        out_shape=jax.ShapeDtypeStruct((n_pad, f_out_p), jnp.bfloat16),
        grid_spec=pltpu.PrefetchScalarGridSpec(
            num_scalar_prefetch=0,
            grid=(n_pad // tm,),
            in_specs=[
                pl.BlockSpec((tm, f_in_p), lambda i: (i, 0)),
                pl.BlockSpec((f_in_p, f_out_p), lambda i: (0, 0)),
                pl.BlockSpec((tm, 1), lambda i: (i, 0)),
            ],
            out_specs=pl.BlockSpec((tm, f_out_p), lambda i: (i, 0)),
        ),
        compiler_params=pltpu.CompilerParams(dimension_semantics=("parallel",)),
    )(x_b, w_b, dis)


def _aggregate(a_bin, xw, dis, bias, tm, tk):
    n_pad = a_bin.shape[0]
    f_pad = xw.shape[1]
    # Keep XW fully VMEM-resident (fetched once, constant index_map) when its
    # double-buffered footprint stays well under the scoped VMEM budget on
    # every generation (incl. v7x's 64 MiB physical / 32 MiB scoped default).
    xw_resident = 2 * (n_pad * f_pad * 2) <= 8 * 1024 * 1024
    if xw_resident:
        xw_spec = pl.BlockSpec((n_pad, f_pad), lambda i, k: (0, 0))
    else:
        xw_spec = pl.BlockSpec((tk, f_pad), lambda i, k: (k, 0))
    return pl.pallas_call(
        _aggregate_kernel,
        out_shape=jax.ShapeDtypeStruct((n_pad, f_pad), jnp.bfloat16),
        grid_spec=pltpu.PrefetchScalarGridSpec(
            num_scalar_prefetch=0,
            grid=(n_pad // tm, n_pad // tk),
            in_specs=[
                pl.BlockSpec((tm, tk), lambda i, k: (i, k)),    # A (int8, 0/1)
                xw_spec,                                        # D^-1/2 XW (bf16)
                pl.BlockSpec((tm, 1), lambda i, k: (i, 0)),     # d_inv_sqrt rows
                pl.BlockSpec((1, f_pad), lambda i, k: (0, 0)),  # bias
            ],
            out_specs=pl.BlockSpec((tm, f_pad), lambda i, k: (i, 0)),
            scratch_shapes=[pltpu.VMEM((tm, f_pad), jnp.float32)],
        ),
        compiler_params=pltpu.CompilerParams(
            dimension_semantics=("parallel", "arbitrary")),
    )(a_bin, xw, dis, bias)


def _pool(p_onehot, inv_counts, h, tk):
    g_pad, n_pad = p_onehot.shape
    f_pad = h.shape[1]
    return pl.pallas_call(
        _pool_kernel,
        out_shape=jax.ShapeDtypeStruct((g_pad, f_pad), jnp.float32),
        grid_spec=pltpu.PrefetchScalarGridSpec(
            num_scalar_prefetch=0,
            grid=(n_pad // tk,),
            in_specs=[
                pl.BlockSpec((g_pad, tk), lambda k: (0, k)),
                pl.BlockSpec((g_pad, 1), lambda k: (0, 0)),
                pl.BlockSpec((tk, f_pad), lambda k: (k, 0)),
            ],
            out_specs=pl.BlockSpec((g_pad, f_pad), lambda k: (0, 0)),
        ),
        compiler_params=pltpu.CompilerParams(dimension_semantics=("arbitrary",)),
    )(p_onehot, inv_counts, h)


def _fused_forward(a_bin, d_inv, p_onehot, inv_counts, x_b, w1_b, b1_p, w2_b, b2_p):
    g_pad = p_onehot.shape[0]
    f_out_p = w2_b.shape[1]

    def spec(shape):
        return pl.BlockSpec(shape, lambda i, _s=shape: (0,) * len(_s))

    return pl.pallas_call(
        _fused_kernel,
        out_shape=jax.ShapeDtypeStruct((g_pad, f_out_p), jnp.float32),
        grid_spec=pltpu.PrefetchScalarGridSpec(
            num_scalar_prefetch=0,
            grid=(1,),
            in_specs=[
                spec(a_bin.shape), spec(d_inv.shape), spec(p_onehot.shape),
                spec(inv_counts.shape), spec(x_b.shape), spec(w1_b.shape),
                spec(b1_p.shape), spec(w2_b.shape), spec(b2_p.shape),
            ],
            out_specs=spec((g_pad, f_out_p)),
        ),
        compiler_params=pltpu.CompilerParams(dimension_semantics=("arbitrary",)),
    )(a_bin, d_inv, p_onehot, inv_counts, x_b, w1_b, b1_p, w2_b, b2_p)


# ------------------------------- forward ------------------------------------ #

def _pad2(v, rows, cols, dtype):
    return jnp.pad(v, ((0, rows - v.shape[0]), (0, cols - v.shape[1]))).astype(dtype)


@functools.partial(jax.jit, static_argnames=("force_tiled",))
def simple_gcn_forward(a_bin, d_inv_sqrt, pool_onehot, inv_counts,
                       x, w1, b1, w2, b2, force_tiled=False):
    """a_bin: (n_pad,n_pad) int8 0/1 adjacency+self-loops (padded, pre-built).
    d_inv_sqrt: (n_pad,1) f32 (0 on padded rows). pool_onehot: (g_pad,n_pad) bf16.
    inv_counts: (g_pad,1) f32. Returns padded (g_pad, f_out_p) f32 pooled output."""
    n_pad = a_bin.shape[0]
    f_in_p = _round_up(x.shape[1], 128)
    hid_p = _round_up(w1.shape[1], 128)
    f_out_p = _round_up(w2.shape[1], 128)

    x_b = _pad2(x, n_pad, f_in_p, jnp.bfloat16)
    w1_b = _pad2(w1, f_in_p, hid_p, jnp.bfloat16)
    w2_b = _pad2(w2, hid_p, f_out_p, jnp.bfloat16)
    b1_p = _pad2(b1, 1, hid_p, jnp.float32)
    b2_p = _pad2(b2, 1, f_out_p, jnp.float32)

    # dropout: eval mode -> identity

    fits_fused = (n_pad <= 1024) and max(f_in_p, hid_p, f_out_p) <= 512
    if fits_fused and not force_tiled:
        return _fused_forward(a_bin, d_inv_sqrt, pool_onehot, inv_counts,
                              x_b, w1_b, b1_p, w2_b, b2_p)

    tm = _pick_tm(n_pad)
    tk = _pick_tk(n_pad)
    # Layer 1: h1 = relu(D^-1/2 (A+I) D^-1/2 (X W1) + b1)
    xw1 = _feature_transform(x_b, w1_b, d_inv_sqrt, tm)
    h1 = _aggregate(a_bin, xw1, d_inv_sqrt, b1_p, tm, tk)
    # Layer 2
    hw2 = _feature_transform(h1, w2_b, d_inv_sqrt, tm)
    h2 = _aggregate(a_bin, hw2, d_inv_sqrt, b2_p, tm, tk)
    # scatter_mean pooling
    return _pool(pool_onehot, inv_counts, h2, tk)


# ------------------------------ glue (plain JAX) ----------------------------- #

def build_graph_operands(edge_index, num_nodes, batch, n_pad, g_pad):
    """Padded final-dtype operands built directly (no extra pad+cast pass):
    binary (A+I) in int8, d_inv_sqrt column, one-hot pooling matrix, 1/counts."""
    src, dst = edge_index[0], edge_index[1]
    a = jnp.zeros((n_pad, n_pad), jnp.int8)
    a = a.at[dst, src].set(1)
    diag = jnp.arange(num_nodes)
    a = a.at[diag, diag].set(1)                         # self-loops (exactly 1)
    deg = jnp.sum(a.astype(jnp.float32), axis=1)        # padded rows -> 0
    d_inv_sqrt = jnp.where(deg > 0, jax.lax.rsqrt(jnp.maximum(deg, 1e-12)), 0.0)
    d_inv_sqrt = d_inv_sqrt.reshape(n_pad, 1).astype(jnp.float32)

    graph_ids = jnp.arange(g_pad, dtype=jnp.int32)
    onehot = (batch[None, :] == graph_ids[:, None])     # (g_pad, num_nodes) bool
    onehot = jnp.pad(onehot, ((0, 0), (0, n_pad - num_nodes)))
    counts = jnp.sum(onehot.astype(jnp.float32), axis=1, keepdims=True)
    inv_counts = jnp.where(counts > 0, 1.0 / jnp.maximum(counts, 1.0), 0.0)
    return a, d_inv_sqrt, onehot.astype(jnp.bfloat16), inv_counts.astype(jnp.float32)


def _glorot(key, shape):
    fan_in, fan_out = shape
    limit = jnp.sqrt(6.0 / (fan_in + fan_out))
    return jax.random.uniform(key, shape, jnp.float32, -limit, limit)


if __name__ == "__main__":
    key = jax.random.PRNGKey(0)
    k_x, k_e, k_w1, k_w2, k_x2, k_e2 = jax.random.split(key, 6)

    in_feats, hid_feats, out_feats = 8, 32, 16
    w1 = _glorot(k_w1, (in_feats, hid_feats))
    b1 = jnp.zeros((1, hid_feats), jnp.float32)
    w2 = _glorot(k_w2, (hid_feats, out_feats))
    b2 = jnp.zeros((1, out_feats), jnp.float32)

    def run_case(kx, ke, num_nodes, num_edges, num_graphs, force_tiled):
        x = jax.random.normal(kx, (num_nodes, in_feats), jnp.float32)
        edge_index = jax.random.randint(ke, (2, num_edges), 0, num_nodes, jnp.int32)
        batch = ((jnp.arange(num_nodes) * num_graphs) // num_nodes).astype(jnp.int32)

        n_pad = _round_up(num_nodes, 128)
        g_pad = _round_up(num_graphs, 16)
        a_bin, d_inv, p_onehot, inv_counts = build_graph_operands(
            edge_index, num_nodes, batch, n_pad, g_pad)

        out = simple_gcn_forward(a_bin, d_inv, p_onehot, inv_counts,
                                 x, w1, b1, w2, b2, force_tiled=force_tiled)
        out = jax.block_until_ready(out)[:num_graphs, :out_feats]

        # Pure-JAX f32 reference (tolerance covers bf16 operand quantization).
        hp = jax.lax.Precision.HIGHEST
        a_f = a_bin[:num_nodes, :num_nodes].astype(jnp.float32)
        d = d_inv[:num_nodes, 0]
        a_hat = d[:, None] * a_f * d[None, :]
        h1 = jnp.maximum(
            jnp.dot(a_hat, jnp.dot(x, w1, precision=hp), precision=hp) + b1, 0.0)
        h2 = jnp.maximum(
            jnp.dot(a_hat, jnp.dot(h1, w2, precision=hp), precision=hp) + b2, 0.0)
        onehot = (batch[None, :] == jnp.arange(num_graphs)[:, None]).astype(jnp.float32)
        pool = onehot / jnp.maximum(onehot.sum(axis=1, keepdims=True), 1.0)
        ref = jnp.dot(pool, h2, precision=hp)

        assert out.shape == (num_graphs, out_feats)
        err = float(jnp.max(jnp.abs(out - ref)))
        assert jnp.allclose(out, ref, atol=3e-2, rtol=3e-2), err

    # Tiny graph (16 nodes, 2 graphs): fused single-kernel path.
    run_case(k_x, k_e, num_nodes=16, num_edges=32, num_graphs=2, force_tiled=False)
    # Larger graph: exercise the tiled multi-kernel path (resident-XW aggregate).
    run_case(k_x2, k_e2, num_nodes=300, num_edges=900, num_graphs=3, force_tiled=True)

    print("KERNEL_OK")
</pallas_src>

<mosaic_0001>
module attributes {stable_mosaic.version = 11 : i64} {
  func.func @_fused_kernel(%arg0: i32, %arg1: memref<128x128xi8, #tpu.memory_space<vmem>>, %arg2: memref<128x1xf32, #tpu.memory_space<vmem>>, %arg3: memref<16x128xbf16, #tpu.memory_space<vmem>>, %arg4: memref<16x1xf32, #tpu.memory_space<vmem>>, %arg5: memref<128x128xbf16, #tpu.memory_space<vmem>>, %arg6: memref<128x128xbf16, #tpu.memory_space<vmem>>, %arg7: memref<1x128xf32, #tpu.memory_space<vmem>>, %arg8: memref<128x128xbf16, #tpu.memory_space<vmem>>, %arg9: memref<1x128xf32, #tpu.memory_space<vmem>>, %arg10: memref<16x128xf32, #tpu.memory_space<vmem>>) attributes {dimension_semantics = [#tpu.dimension_semantics<arbitrary>], iteration_bounds = array<i64: 1>, scalar_prefetch = 0 : i64, scratch_operands = 0 : i64, tpu.core_type = #tpu.core_type<tc>, window_params = [{pipeline_mode = #tpu.pipeline_mode<synchronous>, transform_indices = @transform_0, window_bounds = array<i64: 128, 128>}, {pipeline_mode = #tpu.pipeline_mode<synchronous>, transform_indices = @transform_1, window_bounds = array<i64: 128, 1>}, {pipeline_mode = #tpu.pipeline_mode<synchronous>, transform_indices = @transform_2, window_bounds = array<i64: 16, 128>}, {pipeline_mode = #tpu.pipeline_mode<synchronous>, transform_indices = @transform_3, window_bounds = array<i64: 16, 1>}, {pipeline_mode = #tpu.pipeline_mode<synchronous>, transform_indices = @transform_4, window_bounds = array<i64: 128, 128>}, {pipeline_mode = #tpu.pipeline_mode<synchronous>, transform_indices = @transform_5, window_bounds = array<i64: 128, 128>}, {pipeline_mode = #tpu.pipeline_mode<synchronous>, transform_indices = @transform_6, window_bounds = array<i64: 1, 128>}, {pipeline_mode = #tpu.pipeline_mode<synchronous>, transform_indices = @transform_7, window_bounds = array<i64: 128, 128>}, {pipeline_mode = #tpu.pipeline_mode<synchronous>, transform_indices = @transform_8, window_bounds = array<i64: 1, 128>}, {pipeline_mode = #tpu.pipeline_mode<synchronous>, transform_indices = @transform_9, window_bounds = array<i64: 16, 128>}]} {
    %c0 = arith.constant 0 : index
    %c0_0 = arith.constant 0 : index
    %0 = vector.load %arg1[%c0, %c0_0] : memref<128x128xi8, #tpu.memory_space<vmem>>, vector<128x128xi8>
    %1 = arith.sitofp %0 : vector<128x128xi8> to vector<128x128xbf16>
    %c0_1 = arith.constant 0 : index
    %c0_2 = arith.constant 0 : index
    %2 = vector.load %arg2[%c0_1, %c0_2] : memref<128x1xf32, #tpu.memory_space<vmem>>, vector<128x1xf32>
    %cst = arith.constant 0.000000e+00 : f32
    %3 = vector.broadcast %cst : f32 to vector<128x1xf32>
    %4 = arith.cmpf ogt, %2, %3 : vector<128x1xf32>
    %c0_3 = arith.constant 0 : index
    %c0_4 = arith.constant 0 : index
    %5 = vector.load %arg5[%c0_3, %c0_4] : memref<128x128xbf16, #tpu.memory_space<vmem>>, vector<128x128xbf16>
    %c0_5 = arith.constant 0 : index
    %c0_6 = arith.constant 0 : index
    %6 = vector.load %arg6[%c0_5, %c0_6] : memref<128x128xbf16, #tpu.memory_space<vmem>>, vector<128x128xbf16>
    %cst_7 = arith.constant dense<0.000000e+00> : vector<128x128xf32>
    %7 = tpu.matmul %5, %6, %cst_7 {dimension_numbers = #tpu.dot_dimension_numbers<[1], [0], [0], [1], [0, 0, 1, 1], [], []>} : vector<128x128xbf16>, vector<128x128xbf16>, vector<128x128xf32> -> vector<128x128xf32>
    %8 = vector.broadcast %2 : vector<128x1xf32> to vector<128x128xf32>
    %9 = arith.mulf %7, %8 : vector<128x128xf32>
    %10 = arith.truncf %9 : vector<128x128xf32> to vector<128x128xbf16>
    %cst_8 = arith.constant dense<0.000000e+00> : vector<128x128xf32>
    %11 = tpu.matmul %1, %10, %cst_8 {dimension_numbers = #tpu.dot_dimension_numbers<[1], [0], [0], [1], [0, 0, 1, 1], [], []>} : vector<128x128xbf16>, vector<128x128xbf16>, vector<128x128xf32> -> vector<128x128xf32>
    %12 = vector.broadcast %2 : vector<128x1xf32> to vector<128x128xf32>
    %13 = arith.mulf %11, %12 : vector<128x128xf32>
    %c0_9 = arith.constant 0 : index
    %c0_10 = arith.constant 0 : index
    %14 = vector.load %arg7[%c0_9, %c0_10] : memref<1x128xf32, #tpu.memory_space<vmem>>, vector<1x128xf32>
    %15 = vector.broadcast %14 : vector<1x128xf32> to vector<128x128xf32>
    %16 = arith.addf %13, %15 : vector<128x128xf32>
    %cst_11 = arith.constant 0.000000e+00 : f32
    %17 = vector.broadcast %cst_11 : f32 to vector<128x128xf32>
    %18 = arith.maximumf %16, %17 : vector<128x128xf32>
    %cst_12 = arith.constant 0.000000e+00 : f32
    %19 = vector.shape_cast %4 : vector<128x1xi1> to vector<128x1xi1>
    %20 = vector.broadcast %19 : vector<128x1xi1> to vector<128x128xi1>
    %21 = vector.broadcast %cst_12 : f32 to vector<128x128xf32>
    %22 = arith.select %20, %18, %21 : vector<128x128xi1>, vector<128x128xf32>
    %23 = arith.truncf %22 : vector<128x128xf32> to vector<128x128xbf16>
    %c0_13 = arith.constant 0 : index
    %c0_14 = arith.constant 0 : index
    %24 = vector.load %arg8[%c0_13, %c0_14] : memref<128x128xbf16, #tpu.memory_space<vmem>>, vector<128x128xbf16>
    %cst_15 = arith.constant dense<0.000000e+00> : vector<128x128xf32>
    %25 = tpu.matmul %23, %24, %cst_15 {dimension_numbers = #tpu.dot_dimension_numbers<[1], [0], [0], [1], [0, 0, 1, 1], [], []>} : vector<128x128xbf16>, vector<128x128xbf16>, vector<128x128xf32> -> vector<128x128xf32>
    %26 = vector.broadcast %2 : vector<128x1xf32> to vector<128x128xf32>
    %27 = arith.mulf %25, %26 : vector<128x128xf32>
    %28 = arith.truncf %27 : vector<128x128xf32> to vector<128x128xbf16>
    %cst_16 = arith.constant dense<0.000000e+00> : vector<128x128xf32>
    %29 = tpu.matmul %1, %28, %cst_16 {dimension_numbers = #tpu.dot_dimension_numbers<[1], [0], [0], [1], [0, 0, 1, 1], [], []>} : vector<128x128xbf16>, vector<128x128xbf16>, vector<128x128xf32> -> vector<128x128xf32>
    %30 = vector.broadcast %2 : vector<128x1xf32> to vector<128x128xf32>
    %31 = arith.mulf %29, %30 : vector<128x128xf32>
    %c0_17 = arith.constant 0 : index
    %c0_18 = arith.constant 0 : index
    %32 = vector.load %arg9[%c0_17, %c0_18] : memref<1x128xf32, #tpu.memory_space<vmem>>, vector<1x128xf32>
    %33 = vector.broadcast %32 : vector<1x128xf32> to vector<128x128xf32>
    %34 = arith.addf %31, %33 : vector<128x128xf32>
    %cst_19 = arith.constant 0.000000e+00 : f32
    %35 = vector.broadcast %cst_19 : f32 to vector<128x128xf32>
    %36 = arith.maximumf %34, %35 : vector<128x128xf32>
    %cst_20 = arith.constant 0.000000e+00 : f32
    %37 = vector.shape_cast %4 : vector<128x1xi1> to vector<128x1xi1>
    %38 = vector.broadcast %37 : vector<128x1xi1> to vector<128x128xi1>
    %39 = vector.broadcast %cst_20 : f32 to vector<128x128xf32>
    %40 = arith.select %38, %36, %39 : vector<128x128xi1>, vector<128x128xf32>
    %41 = arith.truncf %40 : vector<128x128xf32> to vector<128x128xbf16>
    %c0_21 = arith.constant 0 : index
    %c0_22 = arith.constant 0 : index
    %42 = vector.load %arg3[%c0_21, %c0_22] : memref<16x128xbf16, #tpu.memory_space<vmem>>, vector<16x128xbf16>
    %cst_23 = arith.constant dense<0.000000e+00> : vector<16x128xf32>
    %43 = tpu.matmul %42, %41, %cst_23 {dimension_numbers = #tpu.dot_dimension_numbers<[1], [0], [0], [1], [0, 0, 1, 1], [], []>} : vector<16x128xbf16>, vector<128x128xbf16>, vector<16x128xf32> -> vector<16x128xf32>
    %c0_24 = arith.constant 0 : index
    %c0_25 = arith.constant 0 : index
    %44 = vector.load %arg4[%c0_24, %c0_25] : memref<16x1xf32, #tpu.memory_space<vmem>>, vector<16x1xf32>
    %45 = vector.broadcast %44 : vector<16x1xf32> to vector<16x128xf32>
    %46 = arith.mulf %43, %45 : vector<16x128xf32>
    %c0_26 = arith.constant 0 : index
    %c0_27 = arith.constant 0 : index
    %47 = vector.load %arg10[%c0_26, %c0_27] : memref<16x128xf32, #tpu.memory_space<vmem>>, vector<16x128xf32>
    tpu.vector_store %arg10[%c0_26, %c0_27], %46 {strides = array<i32>} : memref<16x128xf32, #tpu.memory_space<vmem>>, vector<16x128xf32>,
    return
  }
  func.func @transform_0(%arg0: i32) -> (i32, i32) {
    %c0_i32 = arith.constant 0 : i32
    %c0_i32_0 = arith.constant 0 : i32
    %c0_i32_1 = arith.constant 0 : i32
    return %c0_i32, %c0_i32_0 : i32, i32
  }
  func.func @transform_1(%arg0: i32) -> (i32, i32) {
    %c0_i32 = arith.constant 0 : i32
    %c0_i32_0 = arith.constant 0 : i32
    %c0_i32_1 = arith.constant 0 : i32
    return %c0_i32, %c0_i32_0 : i32, i32
  }
  func.func @transform_2(%arg0: i32) -> (i32, i32) {
    %c0_i32 = arith.constant 0 : i32
    %c0_i32_0 = arith.constant 0 : i32
    %c0_i32_1 = arith.constant 0 : i32
    return %c0_i32, %c0_i32_0 : i32, i32
  }
  func.func @transform_3(%arg0: i32) -> (i32, i32) {
    %c0_i32 = arith.constant 0 : i32
    %c0_i32_0 = arith.constant 0 : i32
    %c0_i32_1 = arith.constant 0 : i32
    return %c0_i32, %c0_i32_0 : i32, i32
  }
  func.func @transform_4(%arg0: i32) -> (i32, i32) {
    %c0_i32 = arith.constant 0 : i32
    %c0_i32_0 = arith.constant 0 : i32
    %c0_i32_1 = arith.constant 0 : i32
    return %c0_i32, %c0_i32_0 : i32, i32
  }
  func.func @transform_5(%arg0: i32) -> (i32, i32) {
    %c0_i32 = arith.constant 0 : i32
    %c0_i32_0 = arith.constant 0 : i32
    %c0_i32_1 = arith.constant 0 : i32
    return %c0_i32, %c0_i32_0 : i32, i32
  }
  func.func @transform_6(%arg0: i32) -> (i32, i32) {
    %c0_i32 = arith.constant 0 : i32
    %c0_i32_0 = arith.constant 0 : i32
    %c0_i32_1 = arith.constant 0 : i32
    return %c0_i32, %c0_i32_0 : i32, i32
  }
  func.func @transform_7(%arg0: i32) -> (i32, i32) {
    %c0_i32 = arith.constant 0 : i32
    %c0_i32_0 = arith.constant 0 : i32
    %c0_i32_1 = arith.constant 0 : i32
    return %c0_i32, %c0_i32_0 : i32, i32
  }
  func.func @transform_8(%arg0: i32) -> (i32, i32) {
    %c0_i32 = arith.constant 0 : i32
    %c0_i32_0 = arith.constant 0 : i32
    %c0_i32_1 = arith.constant 0 : i32
    return %c0_i32, %c0_i32_0 : i32, i32
  }
  func.func @transform_9(%arg0: i32) -> (i32, i32) {
    %c0_i32 = arith.constant 0 : i32
    %c0_i32_0 = arith.constant 0 : i32
    %c0_i32_1 = arith.constant 0 : i32
    return %c0_i32, %c0_i32_0 : i32, i32
  }
}

</mosaic_0001>

<bundles_post_ra>
// kernel: simple_gcn_forward.1
= control target key start
LH: loop header
LB: loop body
LE: loop exit
PB: predicated region body
PF: predicated region fallthrough
CT: control target
= control target key end

     0   :  { %v1458_v2 = vmov 0   ;;  %s1949_s0 = inlined_call_operand.vmem [shape: s8[128,128], index: 0, kind: input, shape index: {}]   ;;  %s1950_s1 = inlined_call_operand.vmem [shape: f32[128,1], index: 1, kind: input, shape index: {}]   ;;  %s1951_s2 = inlined_call_operand.vmem [shape: bf16[16,128], index: 2, kind: input, shape index: {}]   ;;  %s1952_s3 = inlined_call_operand.vmem [shape: f32[16,1], index: 3, kind: input, shape index: {}]   ;;  %s1953_s4 = inlined_call_operand.vmem [shape: bf16[128,128], index: 4, kind: input, shape index: {}]   ;;  %s1954_s5 = inlined_call_operand.vmem [shape: bf16[128,128], index: 5, kind: input, shape index: {}]   ;;  %s1955_s6 = inlined_call_operand.vmem [shape: f32[1,128], index: 6, kind: input, shape index: {}]   ;;  %s1956_s7 = inlined_call_operand.vmem [shape: bf16[128,128], index: 7, kind: input, shape index: {}]   ;;  %s1957_s8 = inlined_call_operand.vmem [shape: f32[1,128], index: 8, kind: input, shape index: {}]   ;;  %s1958_s9 = inlined_call_operand.hbm [shape: f32[16,128], index: 9, kind: output, shape index: {}]  }
   0x1   :  { %v1409_v0 = vld [vmem:[%s1954_s5] sm:$0xff]   ;;  %v1410_v1 = vld [vmem:[%s1954_s5 + $0x8] sm:$0xff]   ;;  %1407 = vset.pattern.permute.xlu0 %v1458_v2  ;;  %1408 = vset.pattern.permute.xlu1 %v1458_v2  ;;  %v1411_v3 = vld [vmem:[%s1954_s5 + $0x10] sm:$0xff]  }
   0x2   :  { %1253 = vmatprep.subr.bf16.mxu0 %v1409_v0  ;;  %v1412_v4 = vld [vmem:[%s1954_s5 + $0x18] sm:$0xff]   ;;  %v1417_v5 = vld [vmem:[%s1953_s4] sm:$0xff]   ;;  %v1414_v8 = vld [vmem:[%s1954_s5 + $0x28] sm:$0xff]  }
   0x3   :  { %1254 = vmatpush3.bf16.msra.mxu0 %v1409_v0  ;;  %1269 = vmatprep.mubr.bf16.mxu0 %v1417_v5  ;;  %v1413_v6 = vld [vmem:[%s1954_s5 + $0x20] sm:$0xff]   ;;  %v48_v9 = vld [vmem:[%s1950_s1 + $0x10] sm:$0xff]  ;;  %v47_v10 = vld [vmem:[%s1950_s1 + $0x8] sm:$0xff] }
   0x4   :  { %1255 = vmatprep.subr.bf16.mxu0 %v1410_v1  ;;  %v46_v7 = vld [vmem:[%s1950_s1] sm:$0xff]  ;;  %315 = vperm.xlu1 %1408, %v48_v9   ;;  %v49_v11 = vld [vmem:[%s1950_s1 + $0x18] sm:$0xff]  ;;  %v1415_v12 = vld [vmem:[%s1954_s5 + $0x30] sm:$0xff]  }
   0x5   :  { %305 = vperm.xlu0 %1407, %v46_v7   ;;  %v50_v13 = vld [vmem:[%s1950_s1 + $0x20] sm:$0xff]  ;;  %v51_v14 = vld [vmem:[%s1950_s1 + $0x28] sm:$0xff]  ;;  %v1416_v15 = vld [vmem:[%s1954_s5 + $0x38] sm:$0xff]  }
   0x6   :  { %v52_v16 = vld [vmem:[%s1950_s1 + $0x30] sm:$0xff]  ;;  %v53_v17 = vld [vmem:[%s1950_s1 + $0x38] sm:$0xff]  ;;  %v1570_v18 = vld [vmem:[%s1950_s1 + $0x40] sm:$0xff] }
   0x7   :  { %1256 = vmatpush3.bf16.msra.mxu0 %v1410_v1  ;;  %v55_v19 = vld [vmem:[%s1950_s1 + $0x48] sm:$0xff] }
   0x8   :  { %1257 = vmatprep.subr.bf16.mxu0 %v1411_v3  ;;  %320 = vperm.xlu1 %1408, %v49_v11   ;;  %v1418_v20 = vld [vmem:[%s1953_s4 + $0x8] sm:$0xff]  }
   0x9   :  { %310 = vperm.xlu0 %1407, %v47_v10  }
   0xb   :  { %1258 = vmatpush3.bf16.msra.mxu0 %v1411_v3 }
   0xc   :  { %1259 = vmatprep.subr.bf16.mxu0 %v1412_v4  ;;  %330 = vperm.xlu1 %1408, %v51_v14  }
   0xd   :  { %325 = vperm.xlu0 %1407, %v50_v13  }
   0xf   :  { %1260 = vmatpush3.bf16.msra.mxu0 %v1412_v4 }
  0x10   :  { %1261 = vmatprep.subr.bf16.mxu0 %v1413_v6  ;;  %340 = vperm.xlu1 %1408, %v53_v17  }
  0x11   :  { %335 = vperm.xlu0 %1407, %v52_v16  }
  0x13   :  { %1262 = vmatpush3.bf16.msra.mxu0 %v1413_v6 }
  0x14   :  { %1263 = vmatprep.subr.bf16.mxu0 %v1414_v8 }
  0x17   :  { %1264 = vmatpush3.bf16.msra.mxu0 %v1414_v8 }
  0x18   :  { %1265 = vmatprep.subr.bf16.mxu0 %v1415_v12 }
  0x1b   :  { %1266 = vmatpush3.bf16.msra.mxu0 %v1415_v12 }
  0x1c   :  { %1267 = vmatprep.subr.bf16.mxu0 %v1416_v15 }
  0x1d   :  { %14 = vsyncpa [#allocation3], 0  ;;  %v1419_v21 = vld [vmem:[%s1953_s4 + $0x10] sm:$0xff]   ;;  %345 = vperm.xlu0 %1407, %v1570_v18   ;;  %350 = vperm.xlu1 %1408, %v55_v19   ;;  %v57_v23 = vld [vmem:[%s1950_s1 + $0x58] sm:$0xff]  ;;  %vm62_vm0 = vcmp.gt.f32.partialorder %v46_v7, 0.0  ;;  %vm63_vm1 = vcmp.gt.f32.partialorder %v47_v10, 0.0 }
  0x1e   :  { %v56_v22 = vld [vmem:[%s1950_s1 + $0x50] sm:$0xff]  ;;  %v58_v24 = vld [vmem:[%s1950_s1 + $0x60] sm:$0xff]  ;;  %v59_v25 = vld [vmem:[%s1950_s1 + $0x68] sm:$0xff]  ;;  %v559_v30 = vsel %vm62_vm0, 1, %v1458_v2  ;;  %vm64_vm2 = vcmp.gt.f32.partialorder %v48_v9, 0.0  ;;  %v560_v31 = vsel %vm63_vm1, 1, %v1458_v2 }
  0x1f   :  { %1268 = vmatpush3.bf16.msra.mxu0 %v1416_v15  ;;  %v1420_v26 = vld [vmem:[%s1953_s4 + $0x18] sm:$0xff]   ;;  %v1421_v27 = vld [vmem:[%s1953_s4 + $0x20] sm:$0xff]   ;;  %v60_v28 = vld [vmem:[%s1950_s1 + $0x70] sm:$0xff]  ;;  %vm65_vm3 = vcmp.gt.f32.partialorder %v49_v11, 0.0  ;;  %v561_v34 = vsel %vm64_vm2, 1, %v1458_v2  ;;  %vm66_vm4 = vcmp.gt.f32.partialorder %v50_v13, 0.0 }
  0x20   :  { %v61_v29 = vld [vmem:[%s1950_s1 + $0x78] sm:$0xff]  ;;  %v1422_v32 = vld [vmem:[%s1953_s4 + $0x28] sm:$0xff]   ;;  %v1423_v33 = vld [vmem:[%s1953_s4 + $0x30] sm:$0xff]   ;;  %v562_v35 = vsel %vm65_vm3, 1, %v1458_v2  ;;  %vm67_vm5 = vcmp.gt.f32.partialorder %v51_v14, 0.0  ;;  %v563_v36 = vsel %vm66_vm4, 1, %v1458_v2 }
  0x21   :  { %355 = vperm.xlu0 %1407, %v56_v22   ;;  %360 = vperm.xlu1 %1408, %v57_v23   ;;  %v564_v37 = vsel %vm67_vm5, 1, %v1458_v2  ;;  %vm68_vm6 = vcmp.gt.f32.partialorder %v52_v16, 0.0  ;;  %v1424_v38 = vld [vmem:[%s1953_s4 + $0x38] sm:$0xff]   ;;  %vm69_vm7 = vcmp.gt.f32.partialorder %v53_v17, 0.0  ;;  %vm70_vm8 = vcmp.gt.f32.partialorder %v1570_v18, 0.0  ;;  %v1073_v49 = vld [vmem:[%s1952_s3] sm:$0xff] }
  0x22   :  { %1270 = vmatmul.mubr.bf16.vlgmr.msra.gmra.mrb[0].mxu0 %v1418_v20  ;;  %v565_v39 = vsel %vm68_vm6, 1, %v1458_v2  ;;  %v566_v40 = vsel %vm69_vm7, 1, %v1458_v2  ;;  %vm71_vm9 = vcmp.gt.f32.partialorder %v55_v19, 0.0  ;;  %v567_v41 = vsel %vm70_vm8, 1, %v1458_v2  ;;  %v1074_v50 = vld [vmem:[%s1952_s3 + $0x8] sm:$0xff]  ;;  %v1641_v51 = vld [vmem:[%s1949_s0] sm:$0xff] }
  0x23   :  { %1273 = vmatprep.mubr.bf16.mxu0 %v1419_v21  ;;  %v568_v42 = vsel %vm71_vm9, 1, %v1458_v2  ;;  %vm72_vm10 = vcmp.gt.f32.partialorder %v56_v22, 0.0  ;;  %vm73_vm11 = vcmp.gt.f32.partialorder %v57_v23, 0.0  ;;  %vm74_vm12 = vcmp.gt.f32.partialorder %v58_v24, 0.0  ;;  %v1425_v53 = vld [vmem:[%s1956_s7] sm:$0xff]   ;;  %v1426_v54 = vld [vmem:[%s1956_s7 + $0x8] sm:$0xff]  }
  0x24   :  { %v569_v43 = vsel %vm72_vm10, 1, %v1458_v2  ;;  %v570_v44 = vsel %vm73_vm11, 1, %v1458_v2  ;;  %vm75_vm13 = vcmp.gt.f32.partialorder %v59_v25, 0.0  ;;  %v571_v45 = vsel %vm74_vm12, 1, %v1458_v2  ;;  %1317 = vmatprep.subr.bf16.mxu0 %v1425_v53  ;;  %v1427_v55 = vld [vmem:[%s1956_s7 + $0x10] sm:$0xff]   ;;  %v1428_v56 = vld [vmem:[%s1956_s7 + $0x18] sm:$0xff]  }
  0x25   :  { %365 = vperm.xlu0 %1407, %v58_v24   ;;  %370 = vperm.xlu1 %1408, %v59_v25   ;;  %v572_v46 = vsel %vm75_vm13, 1, %v1458_v2  ;;  %vm76_vm14 = vcmp.gt.f32.partialorder %v60_v28, 0.0  ;;  %vm77_vm15 = vcmp.gt.f32.partialorder %v61_v29, 0.0  ;;  %v38_v52 = vunpack.c.l.s8.bf16 %v1641_v51  ;;  %v1429_v57 = vld [vmem:[%s1956_s7 + $0x20] sm:$0xff]   ;;  %s1461_s11 = smov [#allocation2]  }
  0x26   :  { %v573_v47 = vsel %vm76_vm14, 1, %v1458_v2  ;;  %v574_v48 = vsel %vm77_vm15, 1, %v1458_v2  ;;  %1318 = vmatpush3.bf16.msra.mxu0 %v1425_v53  ;;  %v39_v53 = vunpack.c.h.s8.bf16 %v1641_v51  ;;  %v1459_v51 = vmov 0.0   ;;  %s1094_s12 = sshll.u32 %s1461_s11, 4  ;;  %s1095_s12 = int_to_ptr.vmem [resolvable:$true] %s1094_s12 }
  0x27   :  { %1301 = vmatprep.mubr.bf16.mxu1 %v38_v52  ;;  %1319 = vmatprep.subr.bf16.mxu0 %v1426_v54  ;;  %s1434_s13 = scalar_lea.vmem %s1095_s12, 256  ;;  %p1439_p1 = scmp.lt.s32.totalorder %s1095_s12, %s1095_s12 }
  0x28   :  { %p1435_p0 = scmp.ne.s32.totalorder %s1095_s12, %s1434_s13  ;;  %p1440_p2 = scmp.lt.s32.totalorder %s1434_s13, %s1434_s13 }
  0x29   :  { %375 = vperm.xlu0 %1407, %v60_v28   ;;  %380 = vperm.xlu1 %1408, %v61_v29  }
  0x2a   :  { %1274 = vmatmul.mubr.bf16.gmra.mrb[4].mxu0 %v1420_v26  ;;  %p1441_p3 = por %p1440_p2, %p1439_p1 }
  0x2b   :  { %1277 = vmatprep.mubr.bf16.mxu0 %v1421_v27  ;;  %1320 = vmatpush3.bf16.msra.mxu0 %v1426_v54 }
  0x2c   :  { %1321 = vmatprep.subr.bf16.mxu0 %v1427_v55  ;;  %p1442_p4 = pnand %p1441_p3, %p1435_p0 }
  0x2d   :  { %576 = vperm.xlu0 %1407, %v559_v30   ;;  %579 = vperm.xlu1 %1408, %v560_v31  }
  0x2f   :  { %1322 = vmatpush3.bf16.msra.mxu0 %v1427_v55  ;;  %v1723_v55 = vld [vmem:[%s1949_s0 + $0x10] sm:$0xff] }
  0x30   :  { %1323 = vmatprep.subr.bf16.mxu0 %v1428_v56 }
  0x31   :  { %582 = vperm.xlu0 %1407, %v561_v34   ;;  %585 = vperm.xlu1 %1408, %v562_v35  }
  0x32   :  { %1278 = vmatmul.mubr.bf16.gmra.mrb[8].mxu0 %v1422_v32 }
  0x33   :  { %1281 = vmatprep.mubr.bf16.mxu0 %v1423_v33  ;;  %1324 = vmatpush3.bf16.msra.mxu0 %v1428_v56 }
  0x34   :  { %1325 = vmatprep.subr.bf16.mxu0 %v1429_v57 }
  0x35   :  { %588 = vperm.xlu0 %1407, %v563_v36   ;;  %591 = vperm.xlu1 %1408, %v564_v37  }
  0x37   :  { %1326 = vmatpush3.bf16.msra.mxu0 %v1429_v57  ;;  %v42_v57 = vunpack.c.l.s8.bf16 %v1723_v55 }
  0x39   :  { %594 = vperm.xlu0 %1407, %v565_v39   ;;  %597 = vperm.xlu1 %1408, %v566_v40  }
  0x3a   :  { %1282 = vmatmul.mubr.bf16.gmra.mrb[12].mxu0 %v1424_v38 }
  0x3d   :  { %600 = vperm.xlu0 %1407, %v567_v41   ;;  %603 = vperm.xlu1 %1408, %v568_v42  }
  0x41   :  { %606 = vperm.xlu0 %1407, %v569_v43   ;;  %609 = vperm.xlu1 %1408, %v570_v44  }
  0x45   :  { %612 = vperm.xlu0 %1407, %v571_v45   ;;  %615 = vperm.xlu1 %1408, %v572_v46  }
  0x49   :  { %618 = vperm.xlu0 %1407, %v573_v47   ;;  %621 = vperm.xlu1 %1408, %v574_v48  }
  0x4d   :  { %1077 = vperm.xlu0 %1407, %v1073_v49   ;;  %1082 = vperm.xlu1 %1408, %v1074_v50   ;;  %v1712_v50 = vld [vmem:[%s1949_s0 + $0x8] sm:$0xff] }
  0x4e   :  { %v40_v54 = vunpack.c.l.s8.bf16 %v1712_v50  ;;  %v41_v56 = vunpack.c.h.s8.bf16 %v1712_v50 }
  0x83   :  { %v1663_v59 = vpop.permute.xlu1 %315 }
  0x84   :  { %v1661_v58 = vpop.permute.xlu0 %305 }
  0x87   :  { %v1667_v61 = vpop.permute.xlu1 %320 }
  0x88   :  { %v1665_v60 = vpop.permute.xlu0 %310 }
  0x8b   :  { %v1671_v63 = vpop.permute.xlu1 %330 }
  0x8c   :  { %v1669_v62 = vpop.permute.xlu0 %325 }
  0x8f   :  { %v1675_v3 = vpop.permute.xlu1 %340 }
  0x90   :  { %v1673_v1 = vpop.permute.xlu0 %335 }
  0x9c   :  { %v1681_v12 = vpop.permute.xlu0 %345  ;;  %v1683_v13 = vpop.permute.xlu1 %350 }
  0xa0   :  { %v1689_v22 = vpop.permute.xlu0 %355  ;;  %v1691_v24 = vpop.permute.xlu1 %360 }
  0xa4   :  { %v1693_v29 = vpop.permute.xlu0 %365  ;;  %v1697_v33 = vpop.permute.xlu1 %370 }
  0xa8   :  { %v1701_v39 = vpop.permute.xlu0 %375  ;;  %v1703_v41 = vpop.permute.xlu1 %380 }
  0xf5   :  { %v1271_v0 = vpop.f32.mrb[0].mxu0 }
  0xf6   :  { %v240_v2 = vpop.f32.mrb[1].mxu0  ;;  %v385_v5 = vmul.f32 %v1271_v0, %v1663_v59  ;;  %v1734_v0 = vld [vmem:[%s1949_s0 + $0x18] sm:$0xff] }
  0xf7   :  { %v1272_v4 = vpop.f32.mrb[2].mxu0  ;;  %v383_v8 = vmul.f32 %v1661_v58, %v240_v2  ;;  %v43_v2 = vunpack.c.h.s8.bf16 %v1723_v55 }
  0xf8   :  { %v386_v6 = vmul.f32 %v1272_v4, %v1667_v61  ;;  %v243_v7 = vpop.f32.mrb[3].mxu0  ;;  %v44_v4 = vunpack.c.l.s8.bf16 %v1734_v0 }
  0xf9   :  { %v384_v9 = vmul.f32 %v1665_v60, %v243_v7  ;;  %v1431_v7 = vld [vmem:[%s1956_s7 + $0x30] sm:$0xff]  }
  0xfa   :  { %v400_v10 = vpack.c.bf16 %v386_v6, %v385_v5  ;;  %v45_v5 = vunpack.c.h.s8.bf16 %v1734_v0  ;;  %v1430_v6 = vld [vmem:[%s1956_s7 + $0x28] sm:$0xff]  }
  0xfb   :  { %v399_v11 = vpack.c.bf16 %v384_v9, %v383_v8  ;;  %1327 = vmatprep.subr.bf16.mxu0 %v1430_v6  ;;  %v1432_v8 = vld [vmem:[%s1956_s7 + $0x38] sm:$0xff]   ;;  %v580_v9 = vpop.permute.xlu1 %579 }
  0xfc   :  { %1328 = vmatpush3.bf16.msra.mxu0 %v1430_v6  ;;  %vm624_vm1 = vcmp.eq.s32.totalorder %v580_v9, 1 }
  0xfd   :  { %v1275_v14 = vpop.f32.mrb[4].mxu0  ;;  %1285 = vmatprep.subr.bf16.mxu1 %v399_v11  ;;  %1329 = vmatprep.subr.bf16.mxu0 %v1431_v7 }
  0xfe   :  { %v256_v15 = vpop.f32.mrb[5].mxu0  ;;  %1286 = vmatpush3.bf16.msra.mxu1 %v399_v11  ;;  %v389_v17 = vmul.f32 %v1275_v14, %v1673_v1 }
  0xff   :  { %v1276_v16 = vpop.f32.mrb[6].mxu0  ;;  %1287 = vmatprep.subr.bf16.mxu1 %v400_v10  ;;  %v387_v20 = vmul.f32 %v1669_v62, %v256_v15 }
 0x100   :  { %v390_v18 = vmul.f32 %v1276_v16, %v1675_v3  ;;  %v259_v19 = vpop.f32.mrb[7].mxu0  ;;  %1330 = vmatpush3.bf16.msra.mxu0 %v1431_v7  ;;  %v1759_v16 = vld [vmem:[%s1955_s6] ss:$0 sm:$0xff] }
 0x101   :  { %v388_v21 = vmul.f32 %v1671_v63, %v259_v19  ;;  %1331 = vmatprep.subr.bf16.mxu0 %v1432_v8 }
 0x102   :  { %v402_v23 = vpack.c.bf16 %v390_v18, %v389_v17  ;;  %1288 = vmatpush3.bf16.msra.mxu1 %v400_v10  ;;  %v586_v10 = vpop.permute.xlu1 %585 }
 0x103   :  { %v401_v25 = vpack.c.bf16 %v388_v21, %v387_v20  ;;  %vm626_vm3 = vcmp.eq.s32.totalorder %v586_v10, 1 }
 0x104   :  { %1332 = vmatpush3.bf16.msra.mxu0 %v1432_v8 }
 0x105   :  { %v1279_v26 = vpop.f32.mrb[8].mxu0  ;;  %1289 = vmatprep.subr.bf16.mxu1 %v401_v25  ;;  %1381 = vmatprep.subr.bf16.mxu0 %v1459_v51 }
 0x106   :  { %v272_v27 = vpop.f32.mrb[9].mxu0  ;;  %1290 = vmatpush3.bf16.msra.mxu1 %v401_v25  ;;  %v393_v30 = vmul.f32 %v1279_v26, %v1689_v22  ;;  %v592_v14 = vpop.permute.xlu1 %591 }
 0x107   :  { %v1280_v28 = vpop.f32.mrb[10].mxu0  ;;  %1291 = vmatprep.subr.bf16.mxu1 %v402_v23  ;;  %v391_v34 = vmul.f32 %v1681_v12, %v272_v27  ;;  %vm628_vm7 = vcmp.eq.s32.totalorder %v592_v14, 1 }
 0x108   :  { %v394_v31 = vmul.f32 %v1280_v28, %v1691_v24  ;;  %v275_v32 = vpop.f32.mrb[11].mxu0 }
 0x109   :  { %v392_v35 = vmul.f32 %v1683_v13, %v275_v32 }
 0x10a   :  { %v404_v36 = vpack.c.bf16 %v394_v31, %v393_v30  ;;  %1292 = vmatpush3.bf16.msra.mxu1 %v402_v23  ;;  %v598_v31 = vpop.permute.xlu1 %597 }
 0x10b   :  { %v403_v37 = vpack.c.bf16 %v392_v35, %v391_v34  ;;  %vm630_vm9 = vcmp.eq.s32.totalorder %v598_v31, 1 }
 0x10d   :  { %v1283_v38 = vpop.f32.mrb[12].mxu0  ;;  %1293 = vmatprep.subr.bf16.mxu1 %v403_v37 }
 0x10e   :  { %v288_v40 = vpop.f32.mrb[13].mxu0  ;;  %1294 = vmatpush3.bf16.msra.mxu1 %v403_v37  ;;  %v397_v43 = vmul.f32 %v1283_v38, %v1701_v39  ;;  %v604_v9 = vpop.permute.xlu1 %603 }
 0x10f   :  { %v1284_v42 = vpop.f32.mrb[14].mxu0  ;;  %1295 = vmatprep.subr.bf16.mxu1 %v404_v36  ;;  %v395_v46 = vmul.f32 %v1693_v29, %v288_v40  ;;  %vm632_vm13 = vcmp.eq.s32.totalorder %v604_v9, 1 }
 0x110   :  { %v398_v44 = vmul.f32 %v1284_v42, %v1703_v41  ;;  %v291_v45 = vpop.f32.mrb[15].mxu0 }
 0x111   :  { %v396_v47 = vmul.f32 %v1697_v33, %v291_v45 }
 0x112   :  { %v406_v48 = vpack.c.bf16 %v398_v44, %v397_v43  ;;  %1296 = vmatpush3.bf16.msra.mxu1 %v404_v36 }
 0x113   :  { %v405_v49 = vpack.c.bf16 %v396_v47, %v395_v46 }
 0x115   :  { %1297 = vmatprep.subr.bf16.mxu1 %v405_v49 }
 0x116   :  { %1298 = vmatpush3.bf16.msra.mxu1 %v405_v49 }
 0x117   :  { %1299 = vmatprep.subr.bf16.mxu1 %v406_v48 }
 0x11a   :  { %1300 = vmatpush3.bf16.msra.mxu1 %v406_v48 }
 0x11d   :  { %1302 = vmatmul.mubr.bf16.vlgmr.msra.gmra.mrb[0].mxu1 %v39_v53 }
 0x11e   :  { %1305 = vmatprep.mubr.bf16.mxu1 %v40_v54 }
 0x125   :  { %1306 = vmatmul.mubr.bf16.gmra.mrb[4].mxu1 %v41_v56 }
 0x126   :  { %1309 = vmatprep.mubr.bf16.mxu1 %v42_v57 }
 0x12d   :  { %1310 = vmatmul.mubr.bf16.gmra.mrb[8].mxu1 %v43_v2 }
 0x12e   :  { %1313 = vmatprep.mubr.bf16.mxu1 %v44_v4 }
 0x135   :  { %1314 = vmatmul.mubr.bf16.gmra.mrb[12].mxu1 %v45_v5 }
 0x136   :  { %1365 = vmatprep.mubr.bf16.mxu1 %v38_v52  ;;  %v577_v52 = vpop.permute.xlu0 %576 }
 0x137   :  { %vm623_vm0 = vcmp.eq.s32.totalorder %v577_v52, 1 }
 0x138   :  { %vm1771_vm4 = vmpackc.low %vm624_vm1, %vm623_vm0 }
 0x13a   :  { %v583_v11 = vpop.permute.xlu0 %582 }
 0x13b   :  { %vm625_vm2 = vcmp.eq.s32.totalorder %v583_v11, 1 }
 0x13c   :  { %vm1777_vm5 = vmpackc.low %vm626_vm3, %vm625_vm2 }
 0x13e   :  { %v589_v19 = vpop.permute.xlu0 %588 }
 0x13f   :  { %vm627_vm6 = vcmp.eq.s32.totalorder %v589_v19, 1 }
 0x140   :  { %vm1791_vm10 = vmpackc.low %vm628_vm7, %vm627_vm6 }
 0x142   :  { %v595_v36 = vpop.permute.xlu0 %594 }
 0x143   :  { %vm629_vm8 = vcmp.eq.s32.totalorder %v595_v36, 1 }
 0x144   :  { %vm1797_vm11 = vmpackc.low %vm630_vm9, %vm629_vm8 }
 0x1f0   :  { %v1303_v15 = vpop.f32.mrb[0].mxu1 }
 0x1f1   :  { %v506_v17 = vmul.f32 %v1303_v15, %v1663_v59  ;;  %v441_v18 = vpop.f32.mrb[1].mxu1  ;;  %v601_v15 = vpop.permute.xlu0 %600 }
 0x1f2   :  { %v504_v20 = vmul.f32 %v441_v18, %v1661_v58  ;;  %v1304_v21 = vpop.f32.mrb[2].mxu1  ;;  %vm631_vm12 = vcmp.eq.s32.totalorder %v601_v15, 1 }
 0x1f3   :  { %v529_v23 = vadd.f32 %v1759_v16, %v506_v17  ;;  %v507_v25 = vmul.f32 %v1304_v21, %v1667_v61  ;;  %v444_v26 = vpop.f32.mrb[3].mxu1  ;;  %vm1812_vm0 = vmpackc.low %vm632_vm13, %vm631_vm12  ;;  %vm1460_vm12 = vmmov 0  }
 0x1f4   :  { %v527_v27 = vadd.f32 %v1759_v16, %v504_v20  ;;  %v505_v28 = vmul.f32 %v444_v26, %v1665_v60 }
 0x1f5   :  { %v530_v30 = vadd.f32 %v1759_v16, %v507_v25  ;;  %v545_v34 = vmax.f32 %v529_v23, 0.0  ;;  %v607_v36 = vpop.permute.xlu0 %606 }
 0x1f6   :  { %v528_v32 = vadd.f32 %v1759_v16, %v505_v28  ;;  %v543_v37 = vmax.f32 %v527_v27, 0.0  ;;  %vm633_vm14 = vcmp.eq.s32.totalorder %v607_v36, 1 }
 0x1f7   :  { %v546_v35 = vmax.f32 %v530_v30, 0.0  ;;  %v610_v30 = vpop.permute.xlu1 %609 }
 0x1f8   :  { %v544_v38 = vmax.f32 %v528_v32, 0.0  ;;  %v1307_v40 = vpop.f32.mrb[4].mxu1  ;;  %vm634_vm15 = vcmp.eq.s32.totalorder %v610_v30, 1 }
 0x1f9   :  { %v1134_v42 = vpack.c.bf16 %v546_v35, %v545_v34  ;;  %v510_v43 = vmul.f32 %v1307_v40, %v1673_v1  ;;  %v457_v44 = vpop.f32.mrb[5].mxu1  ;;  %vm1818_vm1 = vmpackc.low %vm634_vm15, %vm633_vm14 }
 0x1fa   :  { %v1131_v45 = vpack.c.bf16 %v544_v38, %v543_v37  ;;  %v508_v46 = vmul.f32 %v457_v44, %v1669_v62  ;;  %v1308_v47 = vpop.f32.mrb[6].mxu1 }
 0x1fb   :  { %v533_v49 = vadd.f32 %v1759_v16, %v510_v43  ;;  %v511_v6 = vmul.f32 %v1308_v47, %v1675_v3  ;;  %v460_v7 = vpop.f32.mrb[7].mxu1  ;;  %v616_v47 = vpop.permute.xlu1 %615 }
 0x1fc   :  { %v531_v52 = vadd.f32 %v1759_v16, %v508_v46  ;;  %v509_v10 = vmul.f32 %v460_v7, %v1671_v63  ;;  %1333 = vmatprep.mubr.msk.bf16.mxu0 %vm1771_vm4, %v1131_v45  ;;  %vm636_vm3 = vcmp.eq.s32.totalorder %v616_v47, 1 }
 0x1fd   :  { %v534_v11 = vadd.f32 %v1759_v16, %v511_v6  ;;  %1334 = vmatmul.mubr.msk.bf16.vlgmr.msra.gmra.mrb[16].mxu0 %vm1777_vm5, %v1134_v42  ;;  %v549_v18 = vmax.f32 %v533_v49, 0.0 }
 0x1fe   :  { %v532_v17 = vadd.f32 %v1759_v16, %v509_v10  ;;  %v547_v21 = vmax.f32 %v531_v52, 0.0 }
 0x1ff   :  { %v550_v20 = vmax.f32 %v534_v11, 0.0 }
 0x200   :  { %v548_v23 = vmax.f32 %v532_v17, 0.0  ;;  %v1311_v25 = vpop.f32.mrb[8].mxu1  ;;  %v613_v17 = vpop.permute.xlu0 %612 }
 0x201   :  { %v1140_v26 = vpack.c.bf16 %v550_v20, %v549_v18  ;;  %v514_v27 = vmul.f32 %v1311_v25, %v1689_v22  ;;  %v473_v28 = vpop.f32.mrb[9].mxu1  ;;  %vm635_vm2 = vcmp.eq.s32.totalorder %v613_v17, 1 }
 0x202   :  { %v1137_v32 = vpack.c.bf16 %v548_v23, %v547_v21  ;;  %v512_v34 = vmul.f32 %v473_v28, %v1681_v12  ;;  %v1312_v35 = vpop.f32.mrb[10].mxu1  ;;  %vm1830_vm8 = vmpackc.low %vm636_vm3, %vm635_vm2  ;;  %v1433_v23 = vld [vmem:[%s1951_s2] sm:$0xff]  }
 0x203   :  { %v537_v14 = vadd.f32 %v1759_v16, %v514_v27  ;;  %v515_v19 = vmul.f32 %v1312_v35, %v1691_v24  ;;  %v476_v38 = vpop.f32.mrb[11].mxu1 }
 0x204   :  { %v535_v40 = vadd.f32 %v1759_v16, %v512_v34  ;;  %v513_v42 = vmul.f32 %v476_v38, %v1683_v13  ;;  %1337 = vmatprep.mubr.msk.bf16.mxu0 %vm1791_vm10, %v1137_v32  ;;  %v622_v32 = vpop.permute.xlu1 %621 }
 0x205   :  { %v538_v43 = vadd.f32 %v1759_v16, %v515_v19  ;;  %1338 = vmatmul.mubr.msk.bf16.gmra.mrb[20].mxu0 %vm1797_vm11, %v1140_v26  ;;  %v553_v45 = vmax.f32 %v537_v14, 0.0  ;;  %v619_v19 = vpop.permute.xlu0 %618  ;;  %vm638_vm7 = vcmp.eq.s32.totalorder %v622_v32, 1 }
 0x206   :  { %v536_v44 = vadd.f32 %v1759_v16, %v513_v42  ;;  %v551_v49 = vmax.f32 %v535_v40, 0.0  ;;  %vm637_vm6 = vcmp.eq.s32.totalorder %v619_v19, 1 }
 0x207   :  { %v554_v46 = vmax.f32 %v538_v43, 0.0  ;;  %vm1834_vm9 = vmpackc.low %vm638_vm7, %vm637_vm6 }
 0x208   :  { %v552_v6 = vmax.f32 %v536_v44, 0.0  ;;  %v1315_v7 = vpop.f32.mrb[12].mxu1 }
 0x209   :  { %v1146_v52 = vpack.c.bf16 %v554_v46, %v553_v45  ;;  %v518_v10 = vmul.f32 %v1315_v7, %v1701_v39  ;;  %v489_v11 = vpop.f32.mrb[13].mxu1  ;;  %v1078_v27 = vpop.permute.xlu0 %1077 }
 0x20a   :  { %v1143_v18 = vpack.c.bf16 %v552_v6, %v551_v49  ;;  %v516_v20 = vmul.f32 %v489_v11, %v1693_v29  ;;  %v1316_v21 = vpop.f32.mrb[14].mxu1 }
 0x20b   :  { %v541_v9 = vadd.f32 %v1759_v16, %v518_v10  ;;  %v519_v25 = vmul.f32 %v1316_v21, %v1703_v41  ;;  %v492_v26 = vpop.f32.mrb[15].mxu1 }
 0x20c   :  { %v539_v28 = vadd.f32 %v1759_v16, %v516_v20  ;;  %v517_v30 = vmul.f32 %v492_v26, %v1697_v33  ;;  %1341 = vmatprep.mubr.msk.bf16.mxu0 %vm1812_vm0, %v1143_v18 }
 0x20d   :  { %v542_v15 = vadd.f32 %v1759_v16, %v519_v25  ;;  %1342 = vmatmul.mubr.msk.bf16.gmra.mrb[24].mxu0 %vm1818_vm1, %v1146_v52  ;;  %v557_v35 = vmax.f32 %v541_v9, 0.0 }
 0x20e   :  { %v540_v34 = vadd.f32 %v1759_v16, %v517_v30  ;;  %v555_v38 = vmax.f32 %v539_v28, 0.0 }
 0x20f   :  { %v558_v14 = vmax.f32 %v542_v15, 0.0 }
 0x210   :  { %v556_v36 = vmax.f32 %v540_v34, 0.0 }
 0x211   :  { %v1152_v40 = vpack.c.bf16 %v558_v14, %v557_v35 }
 0x212   :  { %v1149_v42 = vpack.c.bf16 %v556_v36, %v555_v38 }
 0x214   :  { %1345 = vmatprep.mubr.msk.bf16.mxu0 %vm1830_vm8, %v1149_v42 }
 0x215   :  { %1346 = vmatmul.mubr.msk.bf16.gmra.mrb[28].mxu0 %vm1834_vm9, %v1152_v40 }
 0x216   :  { %1397 = vmatprep.mubr.msk.bf16.mxu0 %vm1460_vm12, %v1459_v51 }
 0x2d0   :  { %v1335_v16 = vpop.f32.mrb[16].mxu0 }
 0x2d1   :  { %v761_v45 = vpop.f32.mrb[17].mxu0  ;;  %v826_v47 = vmul.f32 %v1335_v16, %v1663_v59 }
 0x2d2   :  { %v1336_v46 = vpop.f32.mrb[18].mxu0  ;;  %v824_v7 = vmul.f32 %v761_v45, %v1661_v58 }
 0x2d3   :  { %v827_v49 = vmul.f32 %v1336_v46, %v1667_v61  ;;  %v764_v6 = vpop.f32.mrb[19].mxu0 }
 0x2d4   :  { %v825_v52 = vmul.f32 %v764_v6, %v1665_v60 }
 0x2d5   :  { %v841_v10 = vpack.c.bf16 %v827_v49, %v826_v47 }
 0x2d6   :  { %v840_v11 = vpack.c.bf16 %v825_v52, %v824_v7 }
 0x2d8   :  { %v1339_v17 = vpop.f32.mrb[20].mxu0  ;;  %1349 = vmatprep.subr.bf16.mxu1 %v840_v11 }
 0x2d9   :  { %v777_v18 = vpop.f32.mrb[21].mxu0  ;;  %1350 = vmatpush3.bf16.msra.mxu1 %v840_v11  ;;  %v830_v21 = vmul.f32 %v1339_v17, %v1673_v1 }
 0x2da   :  { %v1340_v20 = vpop.f32.mrb[22].mxu0  ;;  %1351 = vmatprep.subr.bf16.mxu1 %v841_v10  ;;  %v828_v26 = vmul.f32 %v777_v18, %v1669_v62 }
 0x2db   :  { %v831_v9 = vmul.f32 %v1340_v20, %v1675_v3  ;;  %v780_v25 = vpop.f32.mrb[23].mxu0 }
 0x2dc   :  { %v829_v28 = vmul.f32 %v780_v25, %v1671_v63 }
 0x2dd   :  { %v843_v30 = vpack.c.bf16 %v831_v9, %v830_v21  ;;  %1352 = vmatpush3.bf16.msra.mxu1 %v841_v10 }
 0x2de   :  { %v842_v15 = vpack.c.bf16 %v829_v28, %v828_v26 }
 0x2e0   :  { %v1343_v32 = vpop.f32.mrb[24].mxu0  ;;  %1353 = vmatprep.subr.bf16.mxu1 %v842_v15 }
 0x2e1   :  { %v793_v34 = vpop.f32.mrb[25].mxu0  ;;  %1354 = vmatpush3.bf16.msra.mxu1 %v842_v15  ;;  %v834_v14 = vmul.f32 %v1343_v32, %v1689_v22 }
 0x2e2   :  { %v1344_v35 = vpop.f32.mrb[26].mxu0  ;;  %1355 = vmatprep.subr.bf16.mxu1 %v843_v30  ;;  %v832_v36 = vmul.f32 %v793_v34, %v1681_v12 }
 0x2e3   :  { %v835_v19 = vmul.f32 %v1344_v35, %v1691_v24  ;;  %v796_v38 = vpop.f32.mrb[27].mxu0 }
 0x2e4   :  { %v833_v40 = vmul.f32 %v796_v38, %v1683_v13 }
 0x2e5   :  { %v845_v42 = vpack.c.bf16 %v835_v19, %v834_v14  ;;  %1356 = vmatpush3.bf16.msra.mxu1 %v843_v30 }
 0x2e6   :  { %v844_v16 = vpack.c.bf16 %v833_v40, %v832_v36 }
 0x2e8   :  { %v1347_v45 = vpop.f32.mrb[28].mxu0  ;;  %1357 = vmatprep.subr.bf16.mxu1 %v844_v16 }
 0x2e9   :  { %v809_v46 = vpop.f32.mrb[29].mxu0  ;;  %1358 = vmatpush3.bf16.msra.mxu1 %v844_v16  ;;  %v838_v49 = vmul.f32 %v1347_v45, %v1701_v39 }
 0x2ea   :  { %v1348_v47 = vpop.f32.mrb[30].mxu0  ;;  %1359 = vmatprep.subr.bf16.mxu1 %v845_v42  ;;  %v836_v52 = vmul.f32 %v809_v46, %v1693_v29 }
 0x2eb   :  { %v839_v6 = vmul.f32 %v1348_v47, %v1703_v41  ;;  %v812_v7 = vpop.f32.mrb[31].mxu0 }
 0x2ec   :  { %v837_v10 = vmul.f32 %v812_v7, %v1697_v33 }
 0x2ed   :  { %v847_v11 = vpack.c.bf16 %v839_v6, %v838_v49  ;;  %1360 = vmatpush3.bf16.msra.mxu1 %v845_v42 }
 0x2ee   :  { %v846_v17 = vpack.c.bf16 %v837_v10, %v836_v52 }
 0x2f0   :  { %1361 = vmatprep.subr.bf16.mxu1 %v846_v17 }
 0x2f1   :  { %1362 = vmatpush3.bf16.msra.mxu1 %v846_v17 }
 0x2f2   :  { %1363 = vmatprep.subr.bf16.mxu1 %v847_v11 }
 0x2f5   :  { %1364 = vmatpush3.bf16.msra.mxu1 %v847_v11 }
 0x2f8   :  { %1366 = vmatmul.mubr.bf16.vlgmr.msra.gmra.mrb[16].mxu1 %v39_v53  ;;  %v1877_v53 = vld [vmem:[%s1957_s8] ss:$0 sm:$0xff] }
 0x2f9   :  { %1369 = vmatprep.mubr.bf16.mxu1 %v40_v54 }
 0x300   :  { %1370 = vmatmul.mubr.bf16.gmra.mrb[20].mxu1 %v41_v56 }
 0x301   :  { %1373 = vmatprep.mubr.bf16.mxu1 %v42_v57 }
 0x308   :  { %1374 = vmatmul.mubr.bf16.gmra.mrb[24].mxu1 %v43_v2 }
 0x309   :  { %1377 = vmatprep.mubr.bf16.mxu1 %v44_v4 }
 0x310   :  { %1378 = vmatmul.mubr.bf16.gmra.mrb[28].mxu1 %v45_v5 }
 0x3cb   :  { %v1367_v50 = vpop.f32.mrb[16].mxu1 }
 0x3cc   :  { %v947_v54 = vmul.f32 %v1367_v50, %v1663_v59  ;;  %v882_v55 = vpop.f32.mrb[17].mxu1 }
 0x3cd   :  { %v945_v56 = vmul.f32 %v882_v55, %v1661_v58  ;;  %v1368_v57 = vpop.f32.mrb[18].mxu1 }
 0x3ce   :  { %v970_v0 = vadd.f32 %v1877_v53, %v947_v54  ;;  %v948_v2 = vmul.f32 %v1368_v57, %v1667_v61  ;;  %v885_v4 = vpop.f32.mrb[19].mxu1 }
 0x3cf   :  { %v968_v5 = vadd.f32 %v1877_v53, %v945_v56  ;;  %v946_v18 = vmul.f32 %v885_v4, %v1665_v60 }
 0x3d0   :  { %v971_v20 = vadd.f32 %v1877_v53, %v948_v2  ;;  %v986_v9 = vmax.f32 %v970_v0, 0.0 }
 0x3d1   :  { %v969_v21 = vadd.f32 %v1877_v53, %v946_v18  ;;  %v984_v59 = vmax.f32 %v968_v5, 0.0 }
 0x3d2   :  { %v987_v25 = vmax.f32 %v971_v20, 0.0 }
 0x3d3   :  { %v985_v26 = vmax.f32 %v969_v21, 0.0  ;;  %v1371_v28 = vpop.f32.mrb[20].mxu1 }
 0x3d4   :  { %v1160_v58 = vpack.c.bf16 %v987_v25, %v986_v9  ;;  %v951_v30 = vmul.f32 %v1371_v28, %v1673_v1  ;;  %v898_v15 = vpop.f32.mrb[21].mxu1  ;;  %v1083_v28 = vpop.permute.xlu1 %1082 }
 0x3d5   :  { %v1157_v32 = vpack.c.bf16 %v985_v26, %v984_v59  ;;  %v949_v61 = vmul.f32 %v898_v15, %v1669_v62  ;;  %v1372_v34 = vpop.f32.mrb[22].mxu1 }
 0x3d6   :  { %v974_v35 = vadd.f32 %v1877_v53, %v951_v30  ;;  %v952_v60 = vmul.f32 %v1372_v34, %v1675_v3  ;;  %v901_v14 = vpop.f32.mrb[23].mxu1 }
 0x3d7   :  { %v972_v19 = vadd.f32 %v1877_v53, %v949_v61  ;;  %v950_v38 = vmul.f32 %v901_v14, %v1671_v63  ;;  %1382 = vmatpush3.bf16.msk.msra.mxu0 %vm1771_vm4, %v1157_v32 }
 0x3d8   :  { %v975_v36 = vadd.f32 %v1877_v53, %v952_v60  ;;  %1383 = vmatprep.subr.bf16.mxu0 %v1459_v51  ;;  %v990_v62 = vmax.f32 %v974_v35, 0.0 }
 0x3d9   :  { %v973_v1 = vadd.f32 %v1877_v53, %v950_v38  ;;  %v988_v42 = vmax.f32 %v972_v19, 0.0 }
 0x3da   :  { %v991_v40 = vmax.f32 %v975_v36, 0.0 }
 0x3db   :  { %v989_v16 = vmax.f32 %v973_v1, 0.0  ;;  %v1375_v45 = vpop.f32.mrb[24].mxu1  ;;  %1384 = vmatpush3.bf16.msk.msra.mxu0 %vm1777_vm5, %v1160_v58 }
 0x3dc   :  { %v1166_v3 = vpack.c.bf16 %v991_v40, %v990_v62  ;;  %v955_v63 = vmul.f32 %v1375_v45, %v1689_v22  ;;  %v914_v46 = vpop.f32.mrb[25].mxu1  ;;  %1385 = vmatprep.subr.bf16.mxu0 %v1459_v51 }
 0x3dd   :  { %v1163_v48 = vpack.c.bf16 %v989_v16, %v988_v42  ;;  %v953_v47 = vmul.f32 %v914_v46, %v1681_v12  ;;  %v1376_v49 = vpop.f32.mrb[26].mxu1 }
 0x3de   :  { %v978_v6 = vadd.f32 %v1877_v53, %v955_v63  ;;  %v956_v7 = vmul.f32 %v1376_v49, %v1691_v24  ;;  %v917_v52 = vpop.f32.mrb[27].mxu1 }
 0x3df   :  { %v976_v10 = vadd.f32 %v1877_v53, %v953_v47  ;;  %v954_v8 = vmul.f32 %v917_v52, %v1683_v13  ;;  %1386 = vmatpush3.bf16.msk.msra.mxu0 %vm1791_vm10, %v1163_v48 }
 0x3e0   :  { %v979_v22 = vadd.f32 %v1877_v53, %v956_v7  ;;  %1387 = vmatprep.subr.bf16.mxu0 %v1459_v51  ;;  %v994_v12 = vmax.f32 %v978_v6, 0.0 }
 0x3e1   :  { %v977_v11 = vadd.f32 %v1877_v53, %v954_v8  ;;  %v992_v50 = vmax.f32 %v976_v10, 0.0 }
 0x3e2   :  { %v995_v17 = vmax.f32 %v979_v22, 0.0 }
 0x3e3   :  { %v993_v54 = vmax.f32 %v977_v11, 0.0  ;;  %v1379_v55 = vpop.f32.mrb[28].mxu1  ;;  %1388 = vmatpush3.bf16.msk.msra.mxu0 %vm1797_vm11, %v1166_v3 }
 0x3e4   :  { %v1172_v24 = vpack.c.bf16 %v995_v17, %v994_v12  ;;  %v959_v13 = vmul.f32 %v1379_v55, %v1701_v39  ;;  %v930_v56 = vpop.f32.mrb[29].mxu1  ;;  %1389 = vmatprep.subr.bf16.mxu0 %v1459_v51 }
 0x3e5   :  { %v1169_v37 = vpack.c.bf16 %v993_v54, %v992_v50  ;;  %v957_v57 = vmul.f32 %v930_v56, %v1693_v29  ;;  %v1380_v0 = vpop.f32.mrb[30].mxu1 }
 0x3e6   :  { %v982_v2 = vadd.f32 %v1877_v53, %v959_v13  ;;  %v960_v4 = vmul.f32 %v1380_v0, %v1703_v41  ;;  %v933_v5 = vpop.f32.mrb[31].mxu1 }
 0x3e7   :  { %v980_v18 = vadd.f32 %v1877_v53, %v957_v57  ;;  %v958_v31 = vmul.f32 %v933_v5, %v1697_v33  ;;  %1390 = vmatpush3.bf16.msk.msra.mxu0 %vm1812_vm0, %v1169_v37 }
 0x3e8   :  { %v983_v39 = vadd.f32 %v1877_v53, %v960_v4  ;;  %1391 = vmatprep.subr.bf16.mxu0 %v1459_v51  ;;  %v998_v29 = vmax.f32 %v982_v2, 0.0 }
 0x3e9   :  { %v981_v20 = vadd.f32 %v1877_v53, %v958_v31  ;;  %v996_v9 = vmax.f32 %v980_v18, 0.0 }
 0x3ea   :  { %v999_v21 = vmax.f32 %v983_v39, 0.0 }
 0x3eb   :  { %v997_v25 = vmax.f32 %v981_v20, 0.0  ;;  %1392 = vmatpush3.bf16.msk.msra.mxu0 %vm1818_vm1, %v1172_v24 }
 0x3ec   :  { %v1178_v41 = vpack.c.bf16 %v999_v21, %v998_v29  ;;  %1393 = vmatprep.subr.bf16.mxu0 %v1459_v51 }
 0x3ed   :  { %v1175_v33 = vpack.c.bf16 %v997_v25, %v996_v9 }
 0x3ef   :  { %1394 = vmatpush3.bf16.msk.msra.mxu0 %vm1830_vm8, %v1175_v33 }
 0x3f0   :  { %1395 = vmatprep.subr.bf16.mxu0 %v1459_v51 }
 0x3f3   :  { %1396 = vmatpush3.bf16.msk.msra.mxu0 %vm1834_vm9, %v1178_v41 }
 0x3f6   :  { %1398 = vmatmul.mubr.bf16.vlgmr.msra.gmra.mrb[32].mxu0 %v1433_v23 }
 0x4c9   :  { %v1066_v53 = vpop.f32.mrb[32].mxu0 }
 0x4ca   :  { %v1085_v59 = vmul.f32 %v1078_v27, %v1066_v53  ;;  %v1399_v26 = vpop.f32.mrb[33].mxu0 }
 0x4cb   :  { %v1069_v58 = vpop.f32.mrb[34].mxu0 }
 0x4cc   :  { %1087 = vst [vmem:[#allocation2] sm:$0xff] %v1085_v59  ;;  %v1086_v43 = vmul.f32 %v1083_v28, %v1069_v58  ;;  %v1400_v51 = vpop.f32.mrb[35].mxu0 }
 0x4ce   :  { %1088 = vst [vmem:[#allocation2 + $0x8] sm:$0xff] %v1086_v43 }
 0x4cf   :  { %1445 = shalt.err (!%p1442_p4)
}
 0x4d0   :  { %s1446_s15 = scalar_lea.hbm %s1958_s9, 256 }
 0x4d1   :  { %p1447_p5 = scmp.ne.s32.totalorder %s1958_s9, %s1446_s15  ;;  %p1450_p6 = scmp.lt.u32.totalorder %s1446_s15, %s1958_s9 }
 0x4d3   :  { %p1452_p7 = pnand %p1450_p6, %p1447_p5 }
 0x4d5   :  { %1455 = shalt.err (!%p1452_p7)
}
 0x4d6   :  { %s1462_s19 = smov 128   ;;  %s1463_s20 = smov 8  }
 0x4d7   :  { %1100 = dma.vmem_to_hbm [thread:$0]  %s1095_s12, 256, %s1958_s9, [#allocation3], %s1462_s19, %s1462_s19, %s1463_s20  }
 0x4d8   :  { %1456 = dma.done.wait [#allocation3], 256  }
 0x4d9   :  { %1457 = vsyncadd [#allocation3], 4294967040 }
 0x4da   :  { %1104 = vsyncpa [#allocation3], 1 }

</bundles_post_ra>
